<compile_context>
chip_gen: v7x
topology: tpu7x:2x2x1
jax: 0.10.0
libtpu: 0.0.40
codegen_flags: <defaults>
</compile_context>

<pallas_src>
import jax
import jax.numpy as jnp
from jax.experimental import pallas as pl
from jax.experimental.pallas import tpu as pltpu

N_ACTS = 5           # Sigmoid, Tanh, ReLU, GELU, Swish
N_MIX = N_ACTS + 1   # + Identity  (the 'Zero' op is dropped from the mixture)

_VMEM_BUDGET = 32 * 1024 * 1024   # conservative working-set budget across v5e/v6e/v7x


def _round_up(x, m):
    return ((x + m - 1) // m) * m


# ---------------------------------------------------------------------------
# Pallas kernel: one grid step = one tile of M rows, all edges fused.
# ---------------------------------------------------------------------------
def node_kernel(mixw_ref, x_ref, wt_ref, b_ref, o_ref):
    """
    mixw_ref : SMEM f32[ni*6]            mixture weights (softmax, 'Zero' dropped)
    x_ref    : VMEM f32[ni, bm, Dp]      all edge inputs for this M-tile (pipelined)
    wt_ref   : VMEM bf16[ni, 5, Dp, Dp]  pre-packed de-interleaved weights (resident)
    b_ref    : VMEM f32[ni, 5, 1, Dp]    pre-packed biases (resident)
    o_ref    : VMEM f32[bm, Dp]          output tile (written exactly once)
    """
    ni = x_ref.shape[0]
    mm_dtype = wt_ref.dtype

    acc = jnp.zeros(o_ref.shape, jnp.float32)
    for e in range(ni):  # static unroll: ni is small, removes all per-edge grid overhead
        x = x_ref[e]                      # (bm, Dp) f32
        xb = x.astype(mm_dtype)           # bf16 MXU operand (f32 accumulation below)
        base = e * N_MIX

        def chunk(k, _xb=xb, _e=e):
            # One activation chunk: (bm, Dp) = (bm, Dp) @ (Dp, Dp), f32 accumulate.
            return (jnp.dot(_xb, wt_ref[_e, k], preferred_element_type=jnp.float32)
                    + b_ref[_e, k])

        # Activation + scaled-add right after each chunk's matmul; tree-summed partials
        # keep the live set small and break the serial accumulate dependence chain.
        t0 = mixw_ref[base + 0] * x                                        # Identity
        t0 = t0 + mixw_ref[base + 1] * jax.nn.sigmoid(chunk(0))            # Sigmoid
        t1 = mixw_ref[base + 2] * jnp.tanh(chunk(1))                       # Tanh
        t1 = t1 + mixw_ref[base + 3] * jnp.maximum(chunk(2), 0.0)          # ReLU
        # TODO(synk): repo's custom GELU class is not shown; tanh-approx GELU assumed.
        t2 = mixw_ref[base + 4] * jax.nn.gelu(chunk(3), approximate=True)  # GELU
        y4 = chunk(4)
        t2 = t2 + mixw_ref[base + 5] * (y4 * jax.nn.sigmoid(y4))           # Swish (SiLU)

        acc = acc + ((t0 + t1) + t2)

    o_ref[...] = acc


# ---------------------------------------------------------------------------
# Tiling / packing helpers
# ---------------------------------------------------------------------------
def _choose_tiling(m, d_pad, ni, vmem_budget_bytes):
    """Derive the M-row tile (bm) from a VMEM budget; return (bm, padded M)."""
    # Streamed bytes per tile row: double-buffered x (ni*Dp f32 x2), double-buffered
    # out (Dp f32 x2), plus ~8 Dp-wide f32 rows of in-kernel live temps.
    bytes_per_row = 2 * ni * d_pad * 4 + 2 * d_pad * 4 + 8 * d_pad * 4
    resident = ni * N_ACTS * d_pad * d_pad * 2 + ni * N_ACTS * d_pad * 4  # bf16 W + f32 b
    avail = vmem_budget_bytes - resident - (1 << 20)                      # 1 MiB slack
    bm = max(8, min(1024, (avail // bytes_per_row) // 8 * 8))
    bm = min(bm, _round_up(m, 8))                 # never a tile bigger than (padded) M
    if m > 8:
        # Guarantee >= 2 grid steps so the 'parallel' axis feeds both v7x TensorCores.
        bm = min(bm, _round_up(pl.cdiv(m, 2), 8))
    bm = max(bm, 8)
    m_pad = _round_up(m, bm)
    return bm, m_pad


def pack_node_params(lin_w, lin_b, matmul_dtype=jnp.bfloat16):
    """One-time pre-pack (outside the hot path).

    lin_w : (ni, 5*D, D)  PyTorch-layout Linear weights (per edge)
    lin_b : (ni, 5*D)     PyTorch-layout Linear biases

    Returns
      wt : (ni, 5, Dp, Dp) in `matmul_dtype`; wt[e, k, c, i] == lin_w[e, i*5 + k, c],
           zero-padded to Dp = round_up(D, 128) on both contraction and output dims,
           reproducing the interleaved `.view(..., D, 5).unbind(-1)` split of Edge.forward.
      b  : (ni, 5, 1, Dp) f32 biases packed / padded the same way.
    """
    ni, fived, d = lin_w.shape
    n_acts = fived // d
    d_pad = _round_up(d, 128)
    w = lin_w.reshape(ni, d, n_acts, d)                       # [e, i, k, c]
    wt = jnp.transpose(w, (0, 2, 3, 1))                       # [e, k, c, i]
    wt = jnp.pad(wt, ((0, 0), (0, 0), (0, d_pad - d), (0, d_pad - d)))
    b = jnp.transpose(lin_b.reshape(ni, d, n_acts), (0, 2, 1))   # [e, k, i]
    b = jnp.pad(b, ((0, 0), (0, 0), (0, d_pad - d)))[:, :, None, :]  # [e, k, 1, i]
    return wt.astype(matmul_dtype), b.astype(jnp.float32)


# ---------------------------------------------------------------------------
# Wrapper
# ---------------------------------------------------------------------------
@jax.jit
def node_forward_pallas(xs, wt, b, arch_w):
    """xs: (ni, M, D) f32;  wt: (ni, 5, Dp, Dp) bf16 (pre-packed);  b: (ni, 5, 1, Dp) f32;
    arch_w: (ni*7,) f32 raw architecture logits.  Returns (M, D) f32."""
    ni, m, d = xs.shape
    d_pad = wt.shape[-1]
    nop = N_ACTS + 2

    # softmax over the FULL flattened logit vector, drop the 'Zero' column -> (ni*6,)
    mixw = jax.nn.softmax(arch_w).reshape(ni, nop)[:, 1:].reshape(-1)

    bm, m_pad = _choose_tiling(m, d_pad, ni, _VMEM_BUDGET)
    xs_p = jnp.pad(xs, ((0, 0), (0, m_pad - m), (0, d_pad - d)))

    grid = (m_pad // bm,)
    cost = pl.CostEstimate(
        flops=2 * ni * m_pad * d_pad * N_ACTS * d_pad + 12 * ni * m_pad * d_pad,
        transcendentals=4 * ni * m_pad * d_pad,   # sigmoid x2, tanh, tanh-gelu per edge elem
        bytes_accessed=(xs_p.size * 4 + wt.size * 2 + b.size * 4
                        + m_pad * d_pad * 4 + mixw.size * 4),
    )

    out = pl.pallas_call(
        node_kernel,
        out_shape=jax.ShapeDtypeStruct((m_pad, d_pad), jnp.float32),
        grid=grid,
        in_specs=[
            pl.BlockSpec(memory_space=pltpu.MemorySpace.SMEM),    # mixture scalars
            pl.BlockSpec((ni, bm, d_pad), lambda i: (0, i, 0)),   # x: streamed, pipelined
            pl.BlockSpec(memory_space=pltpu.MemorySpace.VMEM),    # W: resident, single copy
            pl.BlockSpec(memory_space=pltpu.MemorySpace.VMEM),    # b: resident, single copy
        ],
        out_specs=pl.BlockSpec((bm, d_pad), lambda i: (i, 0)),
        compiler_params=pltpu.CompilerParams(
            dimension_semantics=("parallel",),
            vmem_limit_bytes=_VMEM_BUDGET + (16 << 20),
        ),
        cost_estimate=cost,
    )(mixw, xs_p, wt, b)

    return out[:m, :d]


# ---------------------------------------------------------------------------
# Pure-JAX reference (original PyTorch parameter layout, interleaved chunking)
# ---------------------------------------------------------------------------
def node_forward_ref(inputs, lin_w, lin_b, arch_w, mm_dtype=jnp.bfloat16):
    ni, B, S, d = inputs.shape
    n_acts = lin_w.shape[1] // d
    nop = n_acts + 2
    mixw = jax.nn.softmax(arch_w).reshape(ni, nop)[:, 1:]     # drop 'Zero'
    out = jnp.zeros((B, S, d), jnp.float32)
    for e in range(ni):
        x = inputs[e]
        y = jnp.dot(x.astype(mm_dtype), lin_w[e].T.astype(mm_dtype),
                    preferred_element_type=jnp.float32) + lin_b[e]        # (B, S, 5D)
        yc = y.reshape(B, S, d, n_acts)                       # .view(..., D, 5).unbind(-1)
        ops = [
            x,
            jax.nn.sigmoid(yc[..., 0]),
            jnp.tanh(yc[..., 1]),
            jnp.maximum(yc[..., 2], 0.0),
            jax.nn.gelu(yc[..., 3], approximate=True),
            yc[..., 4] * jax.nn.sigmoid(yc[..., 4]),
        ]
        for k, op in enumerate(ops):
            out = out + mixw[e, k] * op
    return out


# ---------------------------------------------------------------------------
# Driver
# ---------------------------------------------------------------------------
if __name__ == "__main__":
    num_input = 2        # Node(num_input, isize)
    isize = 128          # lane-dense hidden size (multiple of 128); any D is handled via padding
    nop = N_ACTS + 2     # Zero, Identity, Sigmoid, Tanh, ReLU, GeLU, Swish
    B, S = 2, 8          # [batch, seq, isize]

    key = jax.random.PRNGKey(0)
    k_x, k_w, k_b, k_arch = jax.random.split(key, 4)

    # Edge inputs: num_input tensors of shape [B, S, isize]
    inputs = jax.random.normal(k_x, (num_input, B, S, isize), dtype=jnp.float32)

    # Per-edge Linear(isize, 5*isize): weight (5*isize, isize), bias (5*isize,)
    lin_w = jax.random.normal(k_w, (num_input, N_ACTS * isize, isize),
                              dtype=jnp.float32) * 0.1
    lin_b = jax.random.normal(k_b, (num_input, N_ACTS * isize),
                              dtype=jnp.float32) * 0.1

    # Architecture logits (module init is zeros; random makes the test stronger).
    arch_w = jax.random.normal(k_arch, (num_input * nop,), dtype=jnp.float32) * 0.5

    # One-time parameter pre-pack (transpose + de-interleave + pad + bf16 cast).
    wt_packed, b_packed = pack_node_params(lin_w, lin_b)

    # Forward: flatten batch dims to M = B*S.
    M = B * S
    xs = inputs.reshape(num_input, M, isize)
    out_flat = node_forward_pallas(xs, wt_packed, b_packed, arch_w)
    out = out_flat.reshape(B, S, isize)
    jax.block_until_ready(out)

    ref = node_forward_ref(inputs, lin_w, lin_b, arch_w)

    # NOTE: dropout=0.0 module default -> no Dropout layer.  Matmul runs bf16 with f32
    # accumulation in both kernel and reference (documented deviation from f32 Linear).
    assert out.shape == (B, S, isize)
    assert jnp.allclose(out, ref, atol=2e-3, rtol=2e-3), "mismatch vs reference"

    print("KERNEL_OK")
</pallas_src>

<mosaic_0001>
module attributes {stable_mosaic.version = 11 : i64} {
  func.func @node_kernel(%arg0: i32, %arg1: memref<12xf32, #tpu.memory_space<smem>>, %arg2: memref<2x8x128xf32, #tpu.memory_space<vmem>>, %arg3: memref<2x5x128x128xbf16, #tpu.memory_space<vmem>>, %arg4: memref<2x5x1x128xf32, #tpu.memory_space<vmem>>, %arg5: memref<8x128xf32, #tpu.memory_space<vmem>>) attributes {dimension_semantics = [#tpu.dimension_semantics<parallel>], iteration_bounds = array<i64: 2>, scalar_prefetch = 0 : i64, scratch_operands = 0 : i64, tpu.core_type = #tpu.core_type<tc>, window_params = [{transform_indices = @transform_0, window_bounds = array<i64: 12>}, {transform_indices = @transform_1, window_bounds = array<i64: 2, 8, 128>}, {pipeline_mode = #tpu.pipeline_mode<synchronous>, transform_indices = @transform_2, window_bounds = array<i64: 2, 5, 128, 128>}, {pipeline_mode = #tpu.pipeline_mode<synchronous>, transform_indices = @transform_3, window_bounds = array<i64: 2, 5, 1, 128>}, {transform_indices = @transform_4, window_bounds = array<i64: 8, 128>}]} {
    %cst = arith.constant 0.000000e+00 : f32
    %0 = vector.broadcast %cst : f32 to vector<8x128xf32>
    %c0 = arith.constant 0 : index
    %c0_0 = arith.constant 0 : index
    %c0_1 = arith.constant 0 : index
    %1 = vector.load %arg2[%c0, %c0_0, %c0_1] : memref<2x8x128xf32, #tpu.memory_space<vmem>>, vector<1x8x128xf32>
    %2 = vector.shape_cast %1 : vector<1x8x128xf32> to vector<8x128xf32>
    %3 = arith.truncf %2 : vector<8x128xf32> to vector<8x128xbf16>
    %c0_2 = arith.constant 0 : index
    %4 = memref.load %arg1[%c0_2] : memref<12xf32, #tpu.memory_space<smem>>
    %5 = vector.broadcast %4 : f32 to vector<8x128xf32>
    %6 = arith.mulf %5, %2 : vector<8x128xf32>
    %c1 = arith.constant 1 : index
    %7 = memref.load %arg1[%c1] : memref<12xf32, #tpu.memory_space<smem>>
    %c0_3 = arith.constant 0 : index
    %c0_4 = arith.constant 0 : index
    %c0_5 = arith.constant 0 : index
    %c0_6 = arith.constant 0 : index
    %8 = vector.load %arg3[%c0_3, %c0_4, %c0_5, %c0_6] : memref<2x5x128x128xbf16, #tpu.memory_space<vmem>>, vector<1x1x128x128xbf16>
    %9 = vector.shape_cast %8 : vector<1x1x128x128xbf16> to vector<128x128xbf16>
    %cst_7 = arith.constant dense<0.000000e+00> : vector<8x128xf32>
    %10 = tpu.matmul %3, %9, %cst_7 {dimension_numbers = #tpu.dot_dimension_numbers<[1], [0], [0], [1], [0, 0, 1, 1], [], []>} : vector<8x128xbf16>, vector<128x128xbf16>, vector<8x128xf32> -> vector<8x128xf32>
    %c0_8 = arith.constant 0 : index
    %c0_9 = arith.constant 0 : index
    %c0_10 = arith.constant 0 : index
    %c0_11 = arith.constant 0 : index
    %11 = vector.load %arg4[%c0_8, %c0_9, %c0_10, %c0_11] : memref<2x5x1x128xf32, #tpu.memory_space<vmem>>, vector<1x1x1x128xf32>
    %12 = vector.shape_cast %11 : vector<1x1x1x128xf32> to vector<1x128xf32>
    %13 = vector.broadcast %12 : vector<1x128xf32> to vector<8x128xf32>
    %14 = arith.addf %10, %13 : vector<8x128xf32>
    %15 = arith.negf %14 : vector<8x128xf32>
    %16 = math.exp %15 : vector<8x128xf32>
    %cst_12 = arith.constant 1.000000e+00 : f32
    %17 = vector.broadcast %cst_12 : f32 to vector<8x128xf32>
    %18 = arith.addf %17, %16 : vector<8x128xf32>
    %19 = arith.divf %17, %18 : vector<8x128xf32>
    %20 = vector.broadcast %7 : f32 to vector<8x128xf32>
    %21 = arith.mulf %20, %19 : vector<8x128xf32>
    %22 = arith.addf %6, %21 : vector<8x128xf32>
    %c2 = arith.constant 2 : index
    %23 = memref.load %arg1[%c2] : memref<12xf32, #tpu.memory_space<smem>>
    %c0_13 = arith.constant 0 : index
    %c1_14 = arith.constant 1 : index
    %c0_15 = arith.constant 0 : index
    %c0_16 = arith.constant 0 : index
    %24 = vector.load %arg3[%c0_13, %c1_14, %c0_15, %c0_16] : memref<2x5x128x128xbf16, #tpu.memory_space<vmem>>, vector<1x1x128x128xbf16>
    %25 = vector.shape_cast %24 : vector<1x1x128x128xbf16> to vector<128x128xbf16>
    %cst_17 = arith.constant dense<0.000000e+00> : vector<8x128xf32>
    %26 = tpu.matmul %3, %25, %cst_17 {dimension_numbers = #tpu.dot_dimension_numbers<[1], [0], [0], [1], [0, 0, 1, 1], [], []>} : vector<8x128xbf16>, vector<128x128xbf16>, vector<8x128xf32> -> vector<8x128xf32>
    %c0_18 = arith.constant 0 : index
    %c1_19 = arith.constant 1 : index
    %c0_20 = arith.constant 0 : index
    %c0_21 = arith.constant 0 : index
    %27 = vector.load %arg4[%c0_18, %c1_19, %c0_20, %c0_21] : memref<2x5x1x128xf32, #tpu.memory_space<vmem>>, vector<1x1x1x128xf32>
    %28 = vector.shape_cast %27 : vector<1x1x1x128xf32> to vector<1x128xf32>
    %29 = vector.broadcast %28 : vector<1x128xf32> to vector<8x128xf32>
    %30 = arith.addf %26, %29 : vector<8x128xf32>
    %31 = math.tanh %30 : vector<8x128xf32>
    %32 = vector.broadcast %23 : f32 to vector<8x128xf32>
    %33 = arith.mulf %32, %31 : vector<8x128xf32>
    %c3 = arith.constant 3 : index
    %34 = memref.load %arg1[%c3] : memref<12xf32, #tpu.memory_space<smem>>
    %c0_22 = arith.constant 0 : index
    %c2_23 = arith.constant 2 : index
    %c0_24 = arith.constant 0 : index
    %c0_25 = arith.constant 0 : index
    %35 = vector.load %arg3[%c0_22, %c2_23, %c0_24, %c0_25] : memref<2x5x128x128xbf16, #tpu.memory_space<vmem>>, vector<1x1x128x128xbf16>
    %36 = vector.shape_cast %35 : vector<1x1x128x128xbf16> to vector<128x128xbf16>
    %cst_26 = arith.constant dense<0.000000e+00> : vector<8x128xf32>
    %37 = tpu.matmul %3, %36, %cst_26 {dimension_numbers = #tpu.dot_dimension_numbers<[1], [0], [0], [1], [0, 0, 1, 1], [], []>} : vector<8x128xbf16>, vector<128x128xbf16>, vector<8x128xf32> -> vector<8x128xf32>
    %c0_27 = arith.constant 0 : index
    %c2_28 = arith.constant 2 : index
    %c0_29 = arith.constant 0 : index
    %c0_30 = arith.constant 0 : index
    %38 = vector.load %arg4[%c0_27, %c2_28, %c0_29, %c0_30] : memref<2x5x1x128xf32, #tpu.memory_space<vmem>>, vector<1x1x1x128xf32>
    %39 = vector.shape_cast %38 : vector<1x1x1x128xf32> to vector<1x128xf32>
    %40 = vector.broadcast %39 : vector<1x128xf32> to vector<8x128xf32>
    %41 = arith.addf %37, %40 : vector<8x128xf32>
    %cst_31 = arith.constant 0.000000e+00 : f32
    %42 = vector.broadcast %cst_31 : f32 to vector<8x128xf32>
    %43 = arith.maximumf %41, %42 : vector<8x128xf32>
    %44 = vector.broadcast %34 : f32 to vector<8x128xf32>
    %45 = arith.mulf %44, %43 : vector<8x128xf32>
    %46 = arith.addf %33, %45 : vector<8x128xf32>
    %c4 = arith.constant 4 : index
    %47 = memref.load %arg1[%c4] : memref<12xf32, #tpu.memory_space<smem>>
    %c0_32 = arith.constant 0 : index
    %c3_33 = arith.constant 3 : index
    %c0_34 = arith.constant 0 : index
    %c0_35 = arith.constant 0 : index
    %48 = vector.load %arg3[%c0_32, %c3_33, %c0_34, %c0_35] : memref<2x5x128x128xbf16, #tpu.memory_space<vmem>>, vector<1x1x128x128xbf16>
    %49 = vector.shape_cast %48 : vector<1x1x128x128xbf16> to vector<128x128xbf16>
    %cst_36 = arith.constant dense<0.000000e+00> : vector<8x128xf32>
    %50 = tpu.matmul %3, %49, %cst_36 {dimension_numbers = #tpu.dot_dimension_numbers<[1], [0], [0], [1], [0, 0, 1, 1], [], []>} : vector<8x128xbf16>, vector<128x128xbf16>, vector<8x128xf32> -> vector<8x128xf32>
    %c0_37 = arith.constant 0 : index
    %c3_38 = arith.constant 3 : index
    %c0_39 = arith.constant 0 : index
    %c0_40 = arith.constant 0 : index
    %51 = vector.load %arg4[%c0_37, %c3_38, %c0_39, %c0_40] : memref<2x5x1x128xf32, #tpu.memory_space<vmem>>, vector<1x1x1x128xf32>
    %52 = vector.shape_cast %51 : vector<1x1x1x128xf32> to vector<1x128xf32>
    %53 = vector.broadcast %52 : vector<1x128xf32> to vector<8x128xf32>
    %54 = arith.addf %50, %53 : vector<8x128xf32>
    %55 = arith.mulf %54, %54 : vector<8x128xf32>
    %56 = arith.mulf %54, %55 : vector<8x128xf32>
    %cst_41 = arith.constant 4.471500e-02 : f32
    %57 = vector.broadcast %cst_41 : f32 to vector<8x128xf32>
    %58 = arith.mulf %57, %56 : vector<8x128xf32>
    %59 = arith.addf %54, %58 : vector<8x128xf32>
    %cst_42 = arith.constant 0.797884583 : f32
    %60 = vector.broadcast %cst_42 : f32 to vector<8x128xf32>
    %61 = arith.mulf %60, %59 : vector<8x128xf32>
    %62 = math.tanh %61 : vector<8x128xf32>
    %cst_43 = arith.constant 1.000000e+00 : f32
    %63 = vector.broadcast %cst_43 : f32 to vector<8x128xf32>
    %64 = arith.addf %63, %62 : vector<8x128xf32>
    %cst_44 = arith.constant 5.000000e-01 : f32
    %65 = vector.broadcast %cst_44 : f32 to vector<8x128xf32>
    %66 = arith.mulf %65, %64 : vector<8x128xf32>
    %67 = arith.mulf %54, %66 : vector<8x128xf32>
    %68 = vector.broadcast %47 : f32 to vector<8x128xf32>
    %69 = arith.mulf %68, %67 : vector<8x128xf32>
    %c0_45 = arith.constant 0 : index
    %c4_46 = arith.constant 4 : index
    %c0_47 = arith.constant 0 : index
    %c0_48 = arith.constant 0 : index
    %70 = vector.load %arg3[%c0_45, %c4_46, %c0_47, %c0_48] : memref<2x5x128x128xbf16, #tpu.memory_space<vmem>>, vector<1x1x128x128xbf16>
    %71 = vector.shape_cast %70 : vector<1x1x128x128xbf16> to vector<128x128xbf16>
    %cst_49 = arith.constant dense<0.000000e+00> : vector<8x128xf32>
    %72 = tpu.matmul %3, %71, %cst_49 {dimension_numbers = #tpu.dot_dimension_numbers<[1], [0], [0], [1], [0, 0, 1, 1], [], []>} : vector<8x128xbf16>, vector<128x128xbf16>, vector<8x128xf32> -> vector<8x128xf32>
    %c0_50 = arith.constant 0 : index
    %c4_51 = arith.constant 4 : index
    %c0_52 = arith.constant 0 : index
    %c0_53 = arith.constant 0 : index
    %73 = vector.load %arg4[%c0_50, %c4_51, %c0_52, %c0_53] : memref<2x5x1x128xf32, #tpu.memory_space<vmem>>, vector<1x1x1x128xf32>
    %74 = vector.shape_cast %73 : vector<1x1x1x128xf32> to vector<1x128xf32>
    %75 = vector.broadcast %74 : vector<1x128xf32> to vector<8x128xf32>
    %76 = arith.addf %72, %75 : vector<8x128xf32>
    %c5 = arith.constant 5 : index
    %77 = memref.load %arg1[%c5] : memref<12xf32, #tpu.memory_space<smem>>
    %78 = arith.negf %76 : vector<8x128xf32>
    %79 = math.exp %78 : vector<8x128xf32>
    %cst_54 = arith.constant 1.000000e+00 : f32
    %80 = vector.broadcast %cst_54 : f32 to vector<8x128xf32>
    %81 = arith.addf %80, %79 : vector<8x128xf32>
    %82 = arith.divf %80, %81 : vector<8x128xf32>
    %83 = arith.mulf %76, %82 : vector<8x128xf32>
    %84 = vector.broadcast %77 : f32 to vector<8x128xf32>
    %85 = arith.mulf %84, %83 : vector<8x128xf32>
    %86 = arith.addf %69, %85 : vector<8x128xf32>
    %87 = arith.addf %22, %46 : vector<8x128xf32>
    %88 = arith.addf %87, %86 : vector<8x128xf32>
    %89 = arith.addf %0, %88 : vector<8x128xf32>
    %c1_55 = arith.constant 1 : index
    %c0_56 = arith.constant 0 : index
    %c0_57 = arith.constant 0 : index
    %90 = vector.load %arg2[%c1_55, %c0_56, %c0_57] : memref<2x8x128xf32, #tpu.memory_space<vmem>>, vector<1x8x128xf32>
    %91 = vector.shape_cast %90 : vector<1x8x128xf32> to vector<8x128xf32>
    %92 = arith.truncf %91 : vector<8x128xf32> to vector<8x128xbf16>
    %c6 = arith.constant 6 : index
    %93 = memref.load %arg1[%c6] : memref<12xf32, #tpu.memory_space<smem>>
    %94 = vector.broadcast %93 : f32 to vector<8x128xf32>
    %95 = arith.mulf %94, %91 : vector<8x128xf32>
    %c7 = arith.constant 7 : index
    %96 = memref.load %arg1[%c7] : memref<12xf32, #tpu.memory_space<smem>>
    %c1_58 = arith.constant 1 : index
    %c0_59 = arith.constant 0 : index
    %c0_60 = arith.constant 0 : index
    %c0_61 = arith.constant 0 : index
    %97 = vector.load %arg3[%c1_58, %c0_59, %c0_60, %c0_61] : memref<2x5x128x128xbf16, #tpu.memory_space<vmem>>, vector<1x1x128x128xbf16>
    %98 = vector.shape_cast %97 : vector<1x1x128x128xbf16> to vector<128x128xbf16>
    %cst_62 = arith.constant dense<0.000000e+00> : vector<8x128xf32>
    %99 = tpu.matmul %92, %98, %cst_62 {dimension_numbers = #tpu.dot_dimension_numbers<[1], [0], [0], [1], [0, 0, 1, 1], [], []>} : vector<8x128xbf16>, vector<128x128xbf16>, vector<8x128xf32> -> vector<8x128xf32>
    %c1_63 = arith.constant 1 : index
    %c0_64 = arith.constant 0 : index
    %c0_65 = arith.constant 0 : index
    %c0_66 = arith.constant 0 : index
    %100 = vector.load %arg4[%c1_63, %c0_64, %c0_65, %c0_66] : memref<2x5x1x128xf32, #tpu.memory_space<vmem>>, vector<1x1x1x128xf32>
    %101 = vector.shape_cast %100 : vector<1x1x1x128xf32> to vector<1x128xf32>
    %102 = vector.broadcast %101 : vector<1x128xf32> to vector<8x128xf32>
    %103 = arith.addf %99, %102 : vector<8x128xf32>
    %104 = arith.negf %103 : vector<8x128xf32>
    %105 = math.exp %104 : vector<8x128xf32>
    %cst_67 = arith.constant 1.000000e+00 : f32
    %106 = vector.broadcast %cst_67 : f32 to vector<8x128xf32>
    %107 = arith.addf %106, %105 : vector<8x128xf32>
    %108 = arith.divf %106, %107 : vector<8x128xf32>
    %109 = vector.broadcast %96 : f32 to vector<8x128xf32>
    %110 = arith.mulf %109, %108 : vector<8x128xf32>
    %111 = arith.addf %95, %110 : vector<8x128xf32>
    %c8 = arith.constant 8 : index
    %112 = memref.load %arg1[%c8] : memref<12xf32, #tpu.memory_space<smem>>
    %c1_68 = arith.constant 1 : index
    %c1_69 = arith.constant 1 : index
    %c0_70 = arith.constant 0 : index
    %c0_71 = arith.constant 0 : index
    %113 = vector.load %arg3[%c1_68, %c1_69, %c0_70, %c0_71] : memref<2x5x128x128xbf16, #tpu.memory_space<vmem>>, vector<1x1x128x128xbf16>
    %114 = vector.shape_cast %113 : vector<1x1x128x128xbf16> to vector<128x128xbf16>
    %cst_72 = arith.constant dense<0.000000e+00> : vector<8x128xf32>
    %115 = tpu.matmul %92, %114, %cst_72 {dimension_numbers = #tpu.dot_dimension_numbers<[1], [0], [0], [1], [0, 0, 1, 1], [], []>} : vector<8x128xbf16>, vector<128x128xbf16>, vector<8x128xf32> -> vector<8x128xf32>
    %c1_73 = arith.constant 1 : index
    %c1_74 = arith.constant 1 : index
    %c0_75 = arith.constant 0 : index
    %c0_76 = arith.constant 0 : index
    %116 = vector.load %arg4[%c1_73, %c1_74, %c0_75, %c0_76] : memref<2x5x1x128xf32, #tpu.memory_space<vmem>>, vector<1x1x1x128xf32>
    %117 = vector.shape_cast %116 : vector<1x1x1x128xf32> to vector<1x128xf32>
    %118 = vector.broadcast %117 : vector<1x128xf32> to vector<8x128xf32>
    %119 = arith.addf %115, %118 : vector<8x128xf32>
    %120 = math.tanh %119 : vector<8x128xf32>
    %121 = vector.broadcast %112 : f32 to vector<8x128xf32>
    %122 = arith.mulf %121, %120 : vector<8x128xf32>
    %c9 = arith.constant 9 : index
    %123 = memref.load %arg1[%c9] : memref<12xf32, #tpu.memory_space<smem>>
    %c1_77 = arith.constant 1 : index
    %c2_78 = arith.constant 2 : index
    %c0_79 = arith.constant 0 : index
    %c0_80 = arith.constant 0 : index
    %124 = vector.load %arg3[%c1_77, %c2_78, %c0_79, %c0_80] : memref<2x5x128x128xbf16, #tpu.memory_space<vmem>>, vector<1x1x128x128xbf16>
    %125 = vector.shape_cast %124 : vector<1x1x128x128xbf16> to vector<128x128xbf16>
    %cst_81 = arith.constant dense<0.000000e+00> : vector<8x128xf32>
    %126 = tpu.matmul %92, %125, %cst_81 {dimension_numbers = #tpu.dot_dimension_numbers<[1], [0], [0], [1], [0, 0, 1, 1], [], []>} : vector<8x128xbf16>, vector<128x128xbf16>, vector<8x128xf32> -> vector<8x128xf32>
    %c1_82 = arith.constant 1 : index
    %c2_83 = arith.constant 2 : index
    %c0_84 = arith.constant 0 : index
    %c0_85 = arith.constant 0 : index
    %127 = vector.load %arg4[%c1_82, %c2_83, %c0_84, %c0_85] : memref<2x5x1x128xf32, #tpu.memory_space<vmem>>, vector<1x1x1x128xf32>
    %128 = vector.shape_cast %127 : vector<1x1x1x128xf32> to vector<1x128xf32>
    %129 = vector.broadcast %128 : vector<1x128xf32> to vector<8x128xf32>
    %130 = arith.addf %126, %129 : vector<8x128xf32>
    %cst_86 = arith.constant 0.000000e+00 : f32
    %131 = vector.broadcast %cst_86 : f32 to vector<8x128xf32>
    %132 = arith.maximumf %130, %131 : vector<8x128xf32>
    %133 = vector.broadcast %123 : f32 to vector<8x128xf32>
    %134 = arith.mulf %133, %132 : vector<8x128xf32>
    %135 = arith.addf %122, %134 : vector<8x128xf32>
    %c10 = arith.constant 10 : index
    %136 = memref.load %arg1[%c10] : memref<12xf32, #tpu.memory_space<smem>>
    %c1_87 = arith.constant 1 : index
    %c3_88 = arith.constant 3 : index
    %c0_89 = arith.constant 0 : index
    %c0_90 = arith.constant 0 : index
    %137 = vector.load %arg3[%c1_87, %c3_88, %c0_89, %c0_90] : memref<2x5x128x128xbf16, #tpu.memory_space<vmem>>, vector<1x1x128x128xbf16>
    %138 = vector.shape_cast %137 : vector<1x1x128x128xbf16> to vector<128x128xbf16>
    %cst_91 = arith.constant dense<0.000000e+00> : vector<8x128xf32>
    %139 = tpu.matmul %92, %138, %cst_91 {dimension_numbers = #tpu.dot_dimension_numbers<[1], [0], [0], [1], [0, 0, 1, 1], [], []>} : vector<8x128xbf16>, vector<128x128xbf16>, vector<8x128xf32> -> vector<8x128xf32>
    %c1_92 = arith.constant 1 : index
    %c3_93 = arith.constant 3 : index
    %c0_94 = arith.constant 0 : index
    %c0_95 = arith.constant 0 : index
    %140 = vector.load %arg4[%c1_92, %c3_93, %c0_94, %c0_95] : memref<2x5x1x128xf32, #tpu.memory_space<vmem>>, vector<1x1x1x128xf32>
    %141 = vector.shape_cast %140 : vector<1x1x1x128xf32> to vector<1x128xf32>
    %142 = vector.broadcast %141 : vector<1x128xf32> to vector<8x128xf32>
    %143 = arith.addf %139, %142 : vector<8x128xf32>
    %144 = arith.mulf %143, %143 : vector<8x128xf32>
    %145 = arith.mulf %143, %144 : vector<8x128xf32>
    %cst_96 = arith.constant 4.471500e-02 : f32
    %146 = vector.broadcast %cst_96 : f32 to vector<8x128xf32>
    %147 = arith.mulf %146, %145 : vector<8x128xf32>
    %148 = arith.addf %143, %147 : vector<8x128xf32>
    %cst_97 = arith.constant 0.797884583 : f32
    %149 = vector.broadcast %cst_97 : f32 to vector<8x128xf32>
    %150 = arith.mulf %149, %148 : vector<8x128xf32>
    %151 = math.tanh %150 : vector<8x128xf32>
    %cst_98 = arith.constant 1.000000e+00 : f32
    %152 = vector.broadcast %cst_98 : f32 to vector<8x128xf32>
    %153 = arith.addf %152, %151 : vector<8x128xf32>
    %cst_99 = arith.constant 5.000000e-01 : f32
    %154 = vector.broadcast %cst_99 : f32 to vector<8x128xf32>
    %155 = arith.mulf %154, %153 : vector<8x128xf32>
    %156 = arith.mulf %143, %155 : vector<8x128xf32>
    %157 = vector.broadcast %136 : f32 to vector<8x128xf32>
    %158 = arith.mulf %157, %156 : vector<8x128xf32>
    %c1_100 = arith.constant 1 : index
    %c4_101 = arith.constant 4 : index
    %c0_102 = arith.constant 0 : index
    %c0_103 = arith.constant 0 : index
    %159 = vector.load %arg3[%c1_100, %c4_101, %c0_102, %c0_103] : memref<2x5x128x128xbf16, #tpu.memory_space<vmem>>, vector<1x1x128x128xbf16>
    %160 = vector.shape_cast %159 : vector<1x1x128x128xbf16> to vector<128x128xbf16>
    %cst_104 = arith.constant dense<0.000000e+00> : vector<8x128xf32>
    %161 = tpu.matmul %92, %160, %cst_104 {dimension_numbers = #tpu.dot_dimension_numbers<[1], [0], [0], [1], [0, 0, 1, 1], [], []>} : vector<8x128xbf16>, vector<128x128xbf16>, vector<8x128xf32> -> vector<8x128xf32>
    %c1_105 = arith.constant 1 : index
    %c4_106 = arith.constant 4 : index
    %c0_107 = arith.constant 0 : index
    %c0_108 = arith.constant 0 : index
    %162 = vector.load %arg4[%c1_105, %c4_106, %c0_107, %c0_108] : memref<2x5x1x128xf32, #tpu.memory_space<vmem>>, vector<1x1x1x128xf32>
    %163 = vector.shape_cast %162 : vector<1x1x1x128xf32> to vector<1x128xf32>
    %164 = vector.broadcast %163 : vector<1x128xf32> to vector<8x128xf32>
    %165 = arith.addf %161, %164 : vector<8x128xf32>
    %c11 = arith.constant 11 : index
    %166 = memref.load %arg1[%c11] : memref<12xf32, #tpu.memory_space<smem>>
    %167 = arith.negf %165 : vector<8x128xf32>
    %168 = math.exp %167 : vector<8x128xf32>
    %cst_109 = arith.constant 1.000000e+00 : f32
    %169 = vector.broadcast %cst_109 : f32 to vector<8x128xf32>
    %170 = arith.addf %169, %168 : vector<8x128xf32>
    %171 = arith.divf %169, %170 : vector<8x128xf32>
    %172 = arith.mulf %165, %171 : vector<8x128xf32>
    %173 = vector.broadcast %166 : f32 to vector<8x128xf32>
    %174 = arith.mulf %173, %172 : vector<8x128xf32>
    %175 = arith.addf %158, %174 : vector<8x128xf32>
    %176 = arith.addf %111, %135 : vector<8x128xf32>
    %177 = arith.addf %176, %175 : vector<8x128xf32>
    %178 = arith.addf %89, %177 : vector<8x128xf32>
    %c0_110 = arith.constant 0 : index
    %c0_111 = arith.constant 0 : index
    %179 = vector.load %arg5[%c0_110, %c0_111] : memref<8x128xf32, #tpu.memory_space<vmem>>, vector<8x128xf32>
    tpu.vector_store %arg5[%c0_110, %c0_111], %178 {strides = array<i32>} : memref<8x128xf32, #tpu.memory_space<vmem>>, vector<8x128xf32>,
    return
  }
  func.func @transform_0(%arg0: i32) -> i32 {
    %c0_i32 = arith.constant 0 : i32
    %c0_i32_0 = arith.constant 0 : i32
    return %c0_i32 : i32
  }
  func.func @transform_1(%arg0: i32) -> (i32, i32, i32) {
    %c0_i32 = arith.constant 0 : i32
    %c0_i32_0 = arith.constant 0 : i32
    %c0_i32_1 = arith.constant 0 : i32
    return %c0_i32, %arg0, %c0_i32_0 : i32, i32, i32
  }
  func.func @transform_2(%arg0: i32) -> (i32, i32, i32, i32) {
    %c0_i32 = arith.constant 0 : i32
    %c0_i32_0 = arith.constant 0 : i32
    %c0_i32_1 = arith.constant 0 : i32
    %c0_i32_2 = arith.constant 0 : i32
    %c0_i32_3 = arith.constant 0 : i32
    return %c0_i32, %c0_i32_0, %c0_i32_1, %c0_i32_2 : i32, i32, i32, i32
  }
  func.func @transform_3(%arg0: i32) -> (i32, i32, i32, i32) {
    %c0_i32 = arith.constant 0 : i32
    %c0_i32_0 = arith.constant 0 : i32
    %c0_i32_1 = arith.constant 0 : i32
    %c0_i32_2 = arith.constant 0 : i32
    %c0_i32_3 = arith.constant 0 : i32
    return %c0_i32, %c0_i32_0, %c0_i32_1, %c0_i32_2 : i32, i32, i32, i32
  }
  func.func @transform_4(%arg0: i32) -> (i32, i32) {
    %c0_i32 = arith.constant 0 : i32
    %c0_i32_0 = arith.constant 0 : i32
    return %arg0, %c0_i32 : i32, i32
  }
}

</mosaic_0001>

<bundles_post_ra>
// kernel: node_forward_pallas.1
= control target key start
LH: loop header
LB: loop body
LE: loop exit
PB: predicated region body
PF: predicated region fallthrough
CT: control target
= control target key end

     0   :  { %s2745_s0 = inlined_call_operand.vmem [shape: f32[12], index: 0, kind: input, shape index: {}]   ;;  %s2746_s1 = inlined_call_operand.hbm [shape: f32[2,16,128], index: 1, kind: input, shape index: {}]   ;;  %s2747_s2 = inlined_call_operand.hbm [shape: bf16[2,5,128,128], index: 2, kind: input, shape index: {}]   ;;  %s2748_s3 = inlined_call_operand.vmem [shape: f32[2,5,1,128], index: 3, kind: input, shape index: {}]   ;;  %s2749_s4 = inlined_call_operand.hbm [shape: f32[16,128], index: 4, kind: output, shape index: {}]  }
   0x1   :  { %2753 = sst [smem:[#allocation14_spill]] %s2745_s0 }
   0x2   :  { %9 = vsyncpa [#allocation5], 0 }
   0x3   :  { %10 = vsyncpa [#allocation3], 0 }
   0x4   :  { %12 = vsyncpa [#allocation3 + $0x1], 0 }
   0x5   :  { %13 = vsyncpa [#allocation8], 0 }
   0x6   :  { %14 = vsyncpa [#allocation4], 0 }
   0x7   :  { %16 = vsyncpa [#allocation4 + $0x1], 0  ;;  %s2365_s15 = smov 0   ;;  %s2367_s16 = smov 0  }
   0x8   :  { %s2369_s17 = smov 0   ;;  %s2371_s18 = smov 0  }
   0x9 LB: > { %s2386_s19 = sadd.s32 4294967295, %s2327_s18   ;;  %s1581_s20 = sadd.s32 4294967294, %s2327_s18   ;;  %s2327_s18 = sphi %s2371_s18, %s2773_s18   ;;  %s2323_s17 = sphi %s2369_s17, %s2772_s17   ;;  %s2319_s16 = sphi %s2367_s16, %s2771_s16   ;;  %s2315_s15 = sphi %s2365_s15, %s2770_s15  }
   0xa   : > { %s2390_s21 = sadd.s32 1, %s2327_s18   ;;  %s50_s22 = sadd.s32 1, %s2323_s17 }
   0xb   : > { %s47_s23 = ssub.s32 %s2327_s18, %s2390_s21  ;;  %p57_p0 = scmp.ne.s32.totalorder %s2323_s17, %s2319_s16 }
   0xc   : > { %p48_p1 = scmp.eq.s32.totalorder %s47_s23, 0  ;;  %p58_p2 = scmp.eq.s32.totalorder %s2327_s18, 0 }
   0xd   : > { %p63_p3 = scmp.ne.s32.totalorder %s2319_s16, %s2315_s15  ;;  %p2750_p4 = scmp.eq.s32.totalorder %s2386_s19, 0 }
   0xe   : > { %s2402_s24 = scalar_select %p48_p1, %s2323_s17, %s50_s22  }
   0xf   : > { %p2404_p5 = por %p58_p2, %p57_p0  ;;  %p2410_p6 = por %p2750_p4, %p63_p3 }
  0x10   : > { %p129_p7 = scmp.eq.s32.totalorder %s2386_s19, 1  ;;  %p135_p8 = scmp.eq.s32.totalorder %s1581_s20, 1 }
  0x11   : > { %s2755_s26 = scalar_select %p2410_p6, 1, 0 }
  0x12   : > { %p1582_p9 = scmp.ge.s32.totalorder %s2327_s18, 1  ;;  %p142_p10 = scmp.lt.s32.totalorder %s2327_s18, 3 }
  0x13   : > { %p2417_p11 = por %p129_p7, %p57_p0  ;;  %p2421_p12 = por %p135_p8, %p63_p3 }
  0x14   : > { %p2425_p13 = pnand %p1582_p9, %p142_p10  ;;  %s2759_s0 = sld [smem:[#allocation14_spill]] }
  0x15   : > { %s2756_s27 = scalar_select %p2417_p11, 1, 0 }
  0x16   : > { %s2757_s28 = scalar_select %p2421_p12, 1, 0 }
  0x17   : > { %p2014_p1 = pneg %p2425_p13  ;;  %p2031_p2 = scmp.lt.s32.totalorder %s2327_s18, 2 }
  0x18   : > { %s2329_s9 = smov [#allocation7]  }
  0x19   : > { %p2438_p7 = pnand %p2014_p1, %p2750_p4  ;;  %p2444_p3 = pnand %p2031_p2, %p2404_p5 }
  0x1a   : > { %s155_s6 = sshll.u32 %s2759_s0, 4  ;;  %s165_s10 = sshll.u32 %s2329_s9, 4  ;;  %s156_s6 = int_to_ptr.vmem [resolvable:$true] %s155_s6  ;;  %s2448_s10 = int_to_ptr.vmem [resolvable:$true] %s165_s10 }
  0x1b   : > { %s2180_s11 = scalar_lea.vmem %s156_s6, 16  ;;  %p2182_p9 = pneg %p2438_p7 }
  0x1c   : > { %p2181_p8 = scmp.ne.s32.totalorder %s156_s6, %s2180_s11  ;;  %p2188_p0 = scmp.lt.s32.totalorder %s156_s6, %s156_s6 }
  0x1d   : > { %p2189_p4 = scmp.lt.s32.totalorder %s2180_s11, %s2180_s11 }
  0x1e   : > { %p2183_p10 = pnand %p2182_p9, %p2181_p8 }
  0x1f   : > { %p2190_p12 = por %p2189_p4, %p2188_p0 }
  0x20   : > { %p2184_p1 = pneg %p2183_p10 }
  0x22   : > { %p2191_p11 = pnand %p2190_p12, %p2184_p1 }
  0x24   : > { %2194 = shalt.err (!%p2191_p11)
}
  0x25   : > { %s2330_s12 = smov [#allocation2]   ;;  %s182_s13 = sand.u32 1, %s2323_s17  }
  0x26   : > { %2017 = dma.vmem_to_smem (!%p2438_p7), %s156_s6, 16, %s2330_s12, [#allocation5]  }
  0x27   : > { %s2195_s22 = scalar_lea.hbm %s2747_s2, 10240 }
  0x28   : > { %p2196_p5 = scmp.ne.s32.totalorder %s2747_s2, %s2195_s22  ;;  %p2202_p11 = scmp.lt.u32.totalorder %s2195_s22, %s2747_s2 }
  0x2a   : > { %p2198_p4 = pnand %p2196_p5, %p2182_p9 }
  0x2c   : > { %p2199_p12 = pneg %p2198_p4 }
  0x2e   : > { %p2204_p0 = pnand %p2202_p11, %p2199_p12 }
  0x30   : > { %2207 = shalt.err (!%p2204_p0)
}
  0x31   : > { %s2208_s6 = scalar_lea.vmem %s2448_s10, 10240  ;;  %p2216_p1 = scmp.lt.s32.totalorder %s2448_s10, %s2448_s10 }
  0x32   : > { %p2209_p2 = scmp.ne.s32.totalorder %s2448_s10, %s2208_s6  ;;  %p2217_p5 = scmp.lt.s32.totalorder %s2208_s6, %s2208_s6 }
  0x34   : > { %p2211_p8 = pnand %p2209_p2, %p2182_p9  ;;  %p2218_p4 = por %p2217_p5, %p2216_p1 }
  0x36   : > { %p2212_p10 = pneg %p2211_p8 }
  0x38   : > { %p2219_p6 = pnand %p2218_p4, %p2212_p10 }
  0x3a   : > { %2222 = shalt.err (!%p2219_p6)
}
  0x3b   : > { %s2331_s9 = smov 64   ;;  %s2332_s11 = smov 4  }
  0x3c   : > { %2020 = dma.hbm_to_vmem [thread:$0]  (!%p2438_p7), %s2747_s2, 10240, %s2448_s10, [#allocation8], %s2331_s9, %s2331_s9, %s2332_s11  }
  0x3d   : > { %s1586_s20 = sshll.u32 %s182_s13, 4  ;;  %s1587_s22 = sshll.u32 %s2327_s18, 7 }
  0x3e   : > { %s2487_s30 = scalar_lea.hbm %s2746_s1, %s1587_s22  ;;  %s186_s5 = scalar_lea.vmem [#allocation6], %s1586_s20 }
  0x3f   : > { %s192_s6 = sshll.u32 %s186_s5, 4  ;;  %s2491_s7 = scalar_lea.sflag [#allocation3], %s182_s13  ;;  %s2489_s6 = int_to_ptr.vmem [resolvable:$true] %s192_s6 }
  0x40   : > { %s2223_s0 = scalar_lea.hbm %s2487_s30, 256  ;;  %p2225_p7 = pneg %p2444_p3 }
  0x41   : > { %p2224_p6 = scmp.ne.s32.totalorder %s2487_s30, %s2223_s0  ;;  %s2228_s11 = scalar_lea.hbm %s2746_s1, 512 }
  0x42   : > { %p2229_p11 = scmp.lt.u32.totalorder %s2487_s30, %s2746_s1  ;;  %p2230_p0 = scmp.lt.u32.totalorder %s2228_s11, %s2223_s0 }
  0x43   : > { %p2226_p9 = pnand %p2225_p7, %p2224_p6  ;;  %p2232_p8 = scmp.lt.u32.totalorder %s2223_s0, %s2487_s30 }
  0x44   : > { %p2231_p2 = por %p2230_p0, %p2229_p11 }
  0x45   : > { %p2227_p12 = pneg %p2226_p9 }
  0x46   : > { %p2233_p10 = por %p2232_p8, %p2231_p2 }
  0x48   : > { %p2234_p1 = pnand %p2233_p10, %p2227_p12 }
  0x4a   : > { %2237 = shalt.err (!%p2234_p1)
}
  0x4b   : > { %s2238_s13 = scalar_lea.vmem %s2489_s6, 256  ;;  %s2333_s20 = smov [#allocation6]  }
  0x4c   : > { %p2239_p5 = scmp.ne.s32.totalorder %s2489_s6, %s2238_s13  ;;  %s2243_s22 = sshll.u32 %s2333_s20, 4  ;;  %s2244_s22 = int_to_ptr.vmem [resolvable:$false] %s2243_s22 }
  0x4d   : > { %s2245_s23 = scalar_lea.vmem %s2244_s22, 512  ;;  %p2246_p9 = scmp.lt.s32.totalorder %s2489_s6, %s2244_s22 }
  0x4e   : > { %p2241_p4 = pnand %p2239_p5, %p2225_p7  ;;  %p2247_p11 = scmp.lt.s32.totalorder %s2245_s23, %s2238_s13 }
  0x50   : > { %p2242_p6 = pneg %p2241_p4  ;;  %p2248_p0 = por %p2247_p11, %p2246_p9 }
  0x52   : > { %p2249_p2 = pnand %p2248_p0, %p2242_p6 }
  0x54   : > { %2252 = shalt.err (!%p2249_p2)
}
  0x55   : > { %s2334_s0 = smov 256   ;;  %s2335_s25 = smov 128  }
  0x56   : > { %s2336_s5 = smov 8   ;;  %204 = sbr.rel (%p2425_p13) target bundleno = 529 (0x211), region = 36 }
  0x57   : > { %2024 = dma.hbm_to_vmem [thread:$0]  (!%p2444_p3), %s2487_s30, 256, %s2489_s6, %s2491_s7, %s2334_s0, %s2335_s25, %s2336_s5  }
  0x58   : > { %p2762_p7 = scmp.eq.s32.totalorder (!%p2425_p13), %s2386_s19, 0 }
  0x5d   : > { %2298 = dma.done.wait (%p2762_p7), [#allocation5], 16   ;;  %p2763_p12 = pmov %p2762_p7 }
  0x5e   : > { %s2526_s10 = sand.u32 1, %s2319_s16   ;;  %p2764_p3 = scmp.ne.s32.totalorder %s2755_s26, 0 }
  0x5f   : > { %2300 = vsyncadd (%p2763_p12), [#allocation5], 4294967280  ;;  %s1590_s9 = sshll.u32 %s2526_s10, 4  ;;  %s211_s11 = scalar_lea.sflag [#allocation3], %s2526_s10 }
  0x60   : > { %s2530_s12 = scalar_lea.vmem [#allocation6], %s1590_s9 }
  0x61   : > { %2302 = dma.done.wait (%p2764_p3), %s211_s11, 256  }
  0x62   : > { %2304 = vsyncadd (%p2764_p3), %s211_s11, 4294967040  ;;  %p2765_p13 = pmov %p2762_p7 }
  0x63   : > { %p2766_p8 = pmov %p2762_p7 }
  0x64   : > { %2306 = dma.done.wait (%p2765_p13), [#allocation8], 10240  }
  0x65   : > { %2308 = vsyncadd (%p2766_p8), [#allocation8], 4294957056 }
  0x66   : > { %223 = sfence }
  0x67   : > { %v2076_v0 = vld [vmem:[#allocation7] sm:$0xff]   ;;  %v2337_v1 = vmov 0.0   ;;  %v2078_v3 = vld [vmem:[#allocation7 + $0x8] sm:$0xff]   ;;  %vm2338_vm0 = vmmov 0   ;;  %v2080_v5 = vld [vmem:[#allocation7 + $0x10] sm:$0xff]   ;;  %s247_s6 = sld [smem:[#allocation2]] }
  0x68   : > { %1802 = vmatprep.subr.bf16.mxu0 %v2337_v1  ;;  %1822 = vmatprep.subr.bf16.mxu1 %v2337_v1  ;;  %v2077_v2 = vld [vmem:[#allocation7 + $0x40] sm:$0xff]   ;;  %v2079_v4 = vld [vmem:[#allocation7 + $0x48] sm:$0xff]   ;;  %v2081_v6 = vld [vmem:[#allocation7 + $0x50] sm:$0xff]   ;;  %s1593_s7 = sld [smem:[#allocation2 + $0x1]]  ;;  %s1604_s14 = sld [smem:[#allocation2 + $0x2]] }
  0x69   : > { %1803 = vmatpush3.bf16.msra.mxu0 %v2076_v0  ;;  %1818 = vmatprep.mubr.msk.bf16.mxu0 %vm2338_vm0, %v2337_v1  ;;  %v2082_v7 = vld [vmem:[#allocation7 + $0x18] sm:$0xff]   ;;  %v2084_v9 = vld [vmem:[#allocation7 + $0x20] sm:$0xff]   ;;  %v2086_v11 = vld [vmem:[#allocation7 + $0x28] sm:$0xff]   ;;  %s1615_s13 = sld [smem:[#allocation2 + $0x3]]  ;;  %s1647_s26 = sld [smem:[#allocation2 + $0x5]] }
  0x6a   : > { %1823 = vmatpush3.bf16.msra.mxu1 %v2077_v2  ;;  %1804 = vmatprep.subr.bf16.mxu0 %v2337_v1  ;;  %v2083_v8 = vld [vmem:[#allocation7 + $0x58] sm:$0xff]   ;;  %v2085_v10 = vld [vmem:[#allocation7 + $0x60] sm:$0xff]   ;;  %v2087_v12 = vld [vmem:[#allocation7 + $0x68] sm:$0xff]   ;;  %s1650_s30 = sld [smem:[#allocation2 + $0x6]]  ;;  %s1685_s5 = sld [smem:[#allocation2 + $0xa]] }
  0x6b   : > { %1824 = vmatprep.subr.bf16.mxu1 %v2337_v1  ;;  %1838 = vmatprep.mubr.msk.bf16.mxu1 %vm2338_vm0, %v2337_v1  ;;  %v2088_v13 = vld [vmem:[#allocation7 + $0x30] sm:$0xff]   ;;  %v2090_v15 = vld [vmem:[#allocation7 + $0x38] sm:$0xff]   ;;  %v2092_v19 = vld [vmem:[#allocation7 + $0x80] sm:$0xff]   ;;  %s1706_s9 = sld [smem:[#allocation2 + $0xb]]  ;;  %s1592_s11 = sshll.u32 %s2526_s10, 3 }
  0x6c   : > { %v2089_v14 = vld [vmem:[#allocation7 + $0x70] sm:$0xff]   ;;  %v2091_v17 = vld [vmem:[#allocation7 + $0x78] sm:$0xff]   ;;  %v2093_v20 = vld [vmem:[#allocation7 + $0xc0] sm:$0xff]   ;;  %p2767_p1 = scmp.ne.s32.totalorder %s2756_s27, 0 }
  0x6d   : > { %1805 = vmatpush3.bf16.msra.mxu0 %v2078_v3  ;;  %v2559_v16 = vld [vmem:[%s2530_s12] sm:$0xff]  ;;  %v2094_v21 = vld [vmem:[#allocation7 + $0x88] sm:$0xff]   ;;  %v2098_v25 = vld [vmem:[#allocation7 + $0x98] sm:$0xff]  }
  0x6e   : > { %1825 = vmatpush3.bf16.msra.mxu1 %v2079_v4  ;;  %1806 = vmatprep.subr.bf16.mxu0 %v2337_v1  ;;  %v2565_v18 = vpack.c.bf16 %v2559_v16, %v2559_v16  ;;  %v2095_v22 = vld [vmem:[#allocation7 + $0xc8] sm:$0xff]   ;;  %v2096_v23 = vld [vmem:[#allocation7 + $0x90] sm:$0xff]   ;;  %v2099_v26 = vld [vmem:[#allocation7 + $0xd8] sm:$0xff]  }
  0x6f   : > { %1826 = vmatprep.subr.bf16.mxu1 %v2337_v1  ;;  %v2097_v24 = vld [vmem:[#allocation7 + $0xd0] sm:$0xff]   ;;  %v2100_v27 = vld [vmem:[#allocation7 + $0xa0] sm:$0xff]   ;;  %v2102_v29 = vld [vmem:[#allocation7 + $0xa8] sm:$0xff]  }
  0x70   : > { %v2101_v28 = vld [vmem:[#allocation7 + $0xe0] sm:$0xff]   ;;  %v2103_v30 = vld [vmem:[#allocation7 + $0xe8] sm:$0xff]   ;;  %v2104_v31 = vld [vmem:[#allocation7 + $0xb0] sm:$0xff]  }
  0x71   : > { %1807 = vmatpush3.bf16.msra.mxu0 %v2080_v5  ;;  %v2105_v32 = vld [vmem:[#allocation7 + $0xf0] sm:$0xff]   ;;  %v2106_v33 = vld [vmem:[#allocation7 + $0xb8] sm:$0xff]   ;;  %v2108_v35 = vld [vmem:[#allocation7 + $0x100] sm:$0xff]  }
  0x72   : > { %1827 = vmatpush3.bf16.msra.mxu1 %v2081_v6  ;;  %1808 = vmatprep.subr.bf16.mxu0 %v2337_v1  ;;  %v2107_v34 = vld [vmem:[#allocation7 + $0xf8] sm:$0xff]   ;;  %v2109_v36 = vld [vmem:[#allocation7 + $0x140] sm:$0xff]   ;;  %v2110_v37 = vld [vmem:[#allocation7 + $0x108] sm:$0xff]  }
  0x73   : > { %1828 = vmatprep.subr.bf16.mxu1 %v2337_v1  ;;  %v2111_v38 = vld [vmem:[#allocation7 + $0x148] sm:$0xff]   ;;  %v2112_v39 = vld [vmem:[#allocation7 + $0x110] sm:$0xff]   ;;  %v2114_v41 = vld [vmem:[#allocation7 + $0x118] sm:$0xff]  }
  0x74   : > { %v2113_v40 = vld [vmem:[#allocation7 + $0x150] sm:$0xff]   ;;  %v2115_v42 = vld [vmem:[#allocation7 + $0x158] sm:$0xff]   ;;  %v2116_v43 = vld [vmem:[#allocation7 + $0x120] sm:$0xff]  }
  0x75   : > { %1809 = vmatpush3.bf16.msra.mxu0 %v2082_v7  ;;  %v2117_v44 = vld [vmem:[#allocation7 + $0x160] sm:$0xff]   ;;  %v2118_v45 = vld [vmem:[#allocation7 + $0x128] sm:$0xff]   ;;  %v2120_v47 = vld [vmem:[#allocation7 + $0x130] sm:$0xff]  }
  0x76   : > { %1829 = vmatpush3.bf16.msra.mxu1 %v2083_v8  ;;  %1810 = vmatprep.subr.bf16.mxu0 %v2337_v1  ;;  %v2119_v46 = vld [vmem:[#allocation7 + $0x168] sm:$0xff]   ;;  %v2121_v48 = vld [vmem:[#allocation7 + $0x170] sm:$0xff]   ;;  %v2122_v49 = vld [vmem:[#allocation7 + $0x138] sm:$0xff]  }
  0x77   : > { %1830 = vmatprep.subr.bf16.mxu1 %v2337_v1  ;;  %v2123_v50 = vld [vmem:[#allocation7 + $0x178] sm:$0xff]   ;;  %v2124_v53 = vld [vmem:[#allocation7 + $0x180] sm:$0xff]   ;;  %v2126_v55 = vld [vmem:[#allocation7 + $0x188] sm:$0xff]  }
  0x78   : > { %v2611_v51 = vld [vmem:[%s2530_s12 + $0x8] sm:$0xff]  ;;  %v2125_v54 = vld [vmem:[#allocation7 + $0x1c0] sm:$0xff]   ;;  %v2128_v57 = vld [vmem:[#allocation7 + $0x190] sm:$0xff]   ;;  %s1626_s12 = sld [smem:[#allocation2 + $0x4]] }
  0x79   : > { %1811 = vmatpush3.bf16.msra.mxu0 %v2084_v9  ;;  %v2616_v52 = vpack.c.bf16 %v2611_v51, %v2611_v51  ;;  %v2127_v56 = vld [vmem:[#allocation7 + $0x1c8] sm:$0xff]   ;;  %v2129_v58 = vld [vmem:[#allocation7 + $0x1d0] sm:$0xff]   ;;  %v2130_v59 = vld [vmem:[#allocation7 + $0x198] sm:$0xff]  }
  0x7a   : > { %1831 = vmatpush3.bf16.msra.mxu1 %v2085_v10  ;;  %1812 = vmatprep.subr.bf16.mxu0 %v2337_v1  ;;  %v2131_v60 = vld [vmem:[#allocation7 + $0x1d8] sm:$0xff]   ;;  %v2132_v61 = vld [vmem:[#allocation7 + $0x1a0] sm:$0xff]   ;;  %v2134_v63 = vld [vmem:[#allocation7 + $0x1a8] sm:$0xff]  }
  0x7b   : > { %1832 = vmatprep.subr.bf16.mxu1 %v2337_v1  ;;  %v2133_v62 = vld [vmem:[#allocation7 + $0x1e0] sm:$0xff]   ;;  %v2135_v0 = vld [vmem:[#allocation7 + $0x1e8] sm:$0xff]   ;;  %v2136_v2 = vld [vmem:[#allocation7 + $0x1b0] sm:$0xff]  }
  0x7c   : > { %v2137_v3 = vld [vmem:[#allocation7 + $0x1f0] sm:$0xff]   ;;  %v2138_v4 = vld [vmem:[#allocation7 + $0x1b8] sm:$0xff]   ;;  %v2140_v6 = vld [vmem:[#allocation7 + $0x200] sm:$0xff]  }
  0x7d   : > { %1813 = vmatpush3.bf16.msra.mxu0 %v2086_v11  ;;  %v2139_v5 = vld [vmem:[#allocation7 + $0x1f8] sm:$0xff]   ;;  %v2141_v7 = vld [vmem:[#allocation7 + $0x240] sm:$0xff]   ;;  %v2142_v8 = vld [vmem:[#allocation7 + $0x208] sm:$0xff]  }
  0x7e   : > { %1833 = vmatpush3.bf16.msra.mxu1 %v2087_v12  ;;  %1814 = vmatprep.subr.bf16.mxu0 %v2337_v1  ;;  %v2143_v9 = vld [vmem:[#allocation7 + $0x248] sm:$0xff]   ;;  %v2144_v10 = vld [vmem:[#allocation7 + $0x210] sm:$0xff]   ;;  %v2146_v12 = vld [vmem:[#allocation7 + $0x218] sm:$0xff]  }
  0x7f   : > { %1834 = vmatprep.subr.bf16.mxu1 %v2337_v1  ;;  %v2145_v11 = vld [vmem:[#allocation7 + $0x250] sm:$0xff]  }
  0x81   : > { %1815 = vmatpush3.bf16.msra.mxu0 %v2088_v13  ;;  %v2147_v13 = vld [vmem:[#allocation7 + $0x258] sm:$0xff]  }
  0x82   : > { %1835 = vmatpush3.bf16.msra.mxu1 %v2089_v14  ;;  %1816 = vmatprep.subr.bf16.mxu0 %v2337_v1  ;;  %v2148_v14 = vld [vmem:[#allocation7 + $0x220] sm:$0xff]  }
  0x83   : > { %1836 = vmatprep.subr.bf16.mxu1 %v2337_v1 }
  0x85   : > { %1817 = vmatpush3.bf16.msra.mxu0 %v2090_v15  ;;  %v2149_v15 = vld [vmem:[#allocation7 + $0x260] sm:$0xff]  }
  0x86   : > { %1837 = vmatpush3.bf16.msra.mxu1 %v2091_v17  ;;  %1842 = vmatprep.subr.bf16.mxu0 %v2337_v1  ;;  %v2150_v17 = vld [vmem:[#allocation7 + $0x228] sm:$0xff]  }
  0x87   : > { %1862 = vmatprep.subr.bf16.mxu1 %v2337_v1 }
  0x88   : > { %1819 = vmatmul.mubr.bf16.vlgmr.msra.gmra.mrb[0].mxu0 %v2565_v18 }
  0x89   : > { %1839 = vmatmul.mubr.bf16.vlgmr.msra.gmra.mrb[0].mxu1 %v2565_v18  ;;  %1843 = vmatpush3.bf16.msra.mxu0 %v2092_v19  ;;  %v2152_v19 = vld [vmem:[#allocation7 + $0x230] sm:$0xff]  }
  0x8a   : > { %1863 = vmatpush3.bf16.msra.mxu1 %v2093_v20  ;;  %1844 = vmatprep.subr.bf16.mxu0 %v2337_v1  ;;  %v2153_v20 = vld [vmem:[#allocation7 + $0x270] sm:$0xff]  }
  0x8b   : > { %1864 = vmatprep.subr.bf16.mxu1 %v2337_v1  ;;  %1858 = vmatprep.mubr.msk.bf16.mxu0 %vm2338_vm0, %v2337_v1 }
  0x8c   : > { %1878 = vmatprep.mubr.msk.bf16.mxu1 %vm2338_vm0, %v2337_v1 }
  0x8d   : > { %1845 = vmatpush3.bf16.msra.mxu0 %v2094_v21  ;;  %v2154_v21 = vld [vmem:[#allocation7 + $0x238] sm:$0xff]  }
  0x8e   : > { %1865 = vmatpush3.bf16.msra.mxu1 %v2095_v22  ;;  %1846 = vmatprep.subr.bf16.mxu0 %v2337_v1  ;;  %v2155_v22 = vld [vmem:[#allocation7 + $0x278] sm:$0xff]  }
  0x8f   : > { %1866 = vmatprep.subr.bf16.mxu1 %v2337_v1 }
  0x91   : > { %1847 = vmatpush3.bf16.msra.mxu0 %v2096_v23  ;;  %v1594_v23 = vld [vmem:[%s2748_s3] ss:$0 sm:$0xff] }
  0x92   : > { %1867 = vmatpush3.bf16.msra.mxu1 %v2097_v24  ;;  %1848 = vmatprep.subr.bf16.mxu0 %v2337_v1 }
  0x93   : > { %1868 = vmatprep.subr.bf16.mxu1 %v2337_v1 }
  0x95   : > { %1849 = vmatpush3.bf16.msra.mxu0 %v2098_v25 }
  0x96   : > { %1869 = vmatpush3.bf16.msra.mxu1 %v2099_v26  ;;  %1850 = vmatprep.subr.bf16.mxu0 %v2337_v1 }
  0x97   : > { %1870 = vmatprep.subr.bf16.mxu1 %v2337_v1 }
  0x99   : > { %1851 = vmatpush3.bf16.msra.mxu0 %v2100_v27 }
  0x9a   : > { %1871 = vmatpush3.bf16.msra.mxu1 %v2101_v28  ;;  %1852 = vmatprep.subr.bf16.mxu0 %v2337_v1 }
  0x9b   : > { %1872 = vmatprep.subr.bf16.mxu1 %v2337_v1 }
  0x9d   : > { %1853 = vmatpush3.bf16.msra.mxu0 %v2102_v29 }
  0x9e   : > { %1873 = vmatpush3.bf16.msra.mxu1 %v2103_v30  ;;  %1854 = vmatprep.subr.bf16.mxu0 %v2337_v1 }
  0x9f   : > { %1874 = vmatprep.subr.bf16.mxu1 %v2337_v1 }
  0xa1   : > { %1855 = vmatpush3.bf16.msra.mxu0 %v2104_v31 }
  0xa2   : > { %1875 = vmatpush3.bf16.msra.mxu1 %v2105_v32  ;;  %1856 = vmatprep.subr.bf16.mxu0 %v2337_v1 }
  0xa3   : > { %1876 = vmatprep.subr.bf16.mxu1 %v2337_v1 }
  0xa5   : > { %1857 = vmatpush3.bf16.msra.mxu0 %v2106_v33 }
  0xa6   : > { %1877 = vmatpush3.bf16.msra.mxu1 %v2107_v34  ;;  %1882 = vmatprep.subr.bf16.mxu0 %v2337_v1  ;;  %v1606_v34 = vld [vmem:[%s2748_s3 + $0x1] ss:$0 sm:$0xff] }
  0xa7   : > { %1902 = vmatprep.subr.bf16.mxu1 %v2337_v1 }
  0xa8   : > { %1859 = vmatmul.mubr.bf16.vlgmr.msra.gmra.mrb[4].mxu0 %v2565_v18 }
  0xa9   : > { %1879 = vmatmul.mubr.bf16.vlgmr.msra.gmra.mrb[4].mxu1 %v2565_v18  ;;  %1883 = vmatpush3.bf16.msra.mxu0 %v2108_v35 }
  0xaa   : > { %1903 = vmatpush3.bf16.msra.mxu1 %v2109_v36  ;;  %1884 = vmatprep.subr.bf16.mxu0 %v2337_v1 }
  0xab   : > { %1904 = vmatprep.subr.bf16.mxu1 %v2337_v1  ;;  %1898 = vmatprep.mubr.msk.bf16.mxu0 %vm2338_vm0, %v2337_v1 }
  0xac   : > { %1918 = vmatprep.mubr.msk.bf16.mxu1 %vm2338_vm0, %v2337_v1 }
  0xad   : > { %1885 = vmatpush3.bf16.msra.mxu0 %v2110_v37  ;;  %v1617_v37 = vld [vmem:[%s2748_s3 + $0x2] ss:$0 sm:$0xff] }
  0xae   : > { %1905 = vmatpush3.bf16.msra.mxu1 %v2111_v38  ;;  %1886 = vmatprep.subr.bf16.mxu0 %v2337_v1 }
  0xaf   : > { %1906 = vmatprep.subr.bf16.mxu1 %v2337_v1 }
  0xb1   : > { %1887 = vmatpush3.bf16.msra.mxu0 %v2112_v39  ;;  %v248_v39 = vstv %s247_s6  ;;  %s1651_s6 = sld [smem:[#allocation2 + $0x7]] }
  0xb2   : > { %1907 = vmatpush3.bf16.msra.mxu1 %v2113_v40  ;;  %1888 = vmatprep.subr.bf16.mxu0 %v2337_v1  ;;  %v368_v40 = vstv %s1593_s7  ;;  %s1674_s7 = sld [smem:[#allocation2 + $0x9]] }
  0xb3   : > { %1908 = vmatprep.subr.bf16.mxu1 %v2337_v1 }
  0xb5   : > { %1889 = vmatpush3.bf16.msra.mxu0 %v2114_v41 }
  0xb6   : > { %1909 = vmatpush3.bf16.msra.mxu1 %v2115_v42  ;;  %1890 = vmatprep.subr.bf16.mxu0 %v2337_v1 }
  0xb7   : > { %1910 = vmatprep.subr.bf16.mxu1 %v2337_v1 }
  0xb9   : > { %1891 = vmatpush3.bf16.msra.mxu0 %v2116_v43 }
  0xba   : > { %1911 = vmatpush3.bf16.msra.mxu1 %v2117_v44  ;;  %1892 = vmatprep.subr.bf16.mxu0 %v2337_v1 }
  0xbb   : > { %1912 = vmatprep.subr.bf16.mxu1 %v2337_v1 }
  0xbd   : > { %1893 = vmatpush3.bf16.msra.mxu0 %v2118_v45 }
  0xbe   : > { %1913 = vmatpush3.bf16.msra.mxu1 %v2119_v46  ;;  %1894 = vmatprep.subr.bf16.mxu0 %v2337_v1  ;;  %v486_v46 = vstv %s1604_s14  ;;  %s1663_s14 = sld [smem:[#allocation2 + $0x8]] }
  0xbf   : > { %1914 = vmatprep.subr.bf16.mxu1 %v2337_v1 }
  0xc1   : > { %1895 = vmatpush3.bf16.msra.mxu0 %v2120_v47  ;;  %v603_v47 = vstv %s1615_s13 }
  0xc2   : > { %1915 = vmatpush3.bf16.msra.mxu1 %v2121_v48  ;;  %1896 = vmatprep.subr.bf16.mxu0 %v2337_v1 }
  0xc3   : > { %1916 = vmatprep.subr.bf16.mxu1 %v2337_v1 }
  0xc5   : > { %1897 = vmatpush3.bf16.msra.mxu0 %v2122_v49 }
  0xc6   : > { %1917 = vmatpush3.bf16.msra.mxu1 %v2123_v50  ;;  %1922 = vmatprep.subr.bf16.mxu0 %v2337_v1  ;;  %v249_v50 = vmul.f32 %v248_v39, %v2559_v16  ;;  %v1638_v16 = vld [vmem:[%s2748_s3 + $0x4] ss:$0 sm:$0xff] }
  0xc7   : > { %1942 = vmatprep.subr.bf16.mxu1 %v2337_v1 }
  0xc8   : > { %1899 = vmatmul.mubr.bf16.vlgmr.msra.gmra.mrb[8].mxu0 %v2565_v18  ;;  %v2151_v18 = vld [vmem:[#allocation7 + $0x268] sm:$0xff]  }
  0xc9   : > { %1919 = vmatmul.mubr.bf16.vlgmr.msra.gmra.mrb[8].mxu1 %v2616_v52  ;;  %1923 = vmatpush3.bf16.msra.mxu0 %v2124_v53 }
  0xca   : > { %1943 = vmatpush3.bf16.msra.mxu1 %v2125_v54  ;;  %1924 = vmatprep.subr.bf16.mxu0 %v2337_v1 }
  0xcb   : > { %1944 = vmatprep.subr.bf16.mxu1 %v2337_v1  ;;  %1938 = vmatprep.mubr.msk.bf16.mxu0 %vm2338_vm0, %v2337_v1 }
  0xcc   : > { %1958 = vmatprep.mubr.msk.bf16.mxu1 %vm2338_vm0, %v2337_v1 }
  0xcd   : > { %1925 = vmatpush3.bf16.msra.mxu0 %v2126_v55 }
  0xce   : > { %1945 = vmatpush3.bf16.msra.mxu1 %v2127_v56  ;;  %1926 = vmatprep.subr.bf16.mxu0 %v2337_v1 }
  0xcf   : > { %1946 = vmatprep.subr.bf16.mxu1 %v2337_v1 }
  0xd1   : > { %1927 = vmatpush3.bf16.msra.mxu0 %v2128_v57 }
  0xd2   : > { %1947 = vmatpush3.bf16.msra.mxu1 %v2129_v58  ;;  %1928 = vmatprep.subr.bf16.mxu0 %v2337_v1 }
  0xd3   : > { %1948 = vmatprep.subr.bf16.mxu1 %v2337_v1 }
  0xd5   : > { %1929 = vmatpush3.bf16.msra.mxu0 %v2130_v59 }
  0xd6   : > { %1949 = vmatpush3.bf16.msra.mxu1 %v2131_v60  ;;  %1930 = vmatprep.subr.bf16.mxu0 %v2337_v1 }
  0xd7   : > { %1950 = vmatprep.subr.bf16.mxu1 %v2337_v1 }
  0xd9   : > { %1931 = vmatpush3.bf16.msra.mxu0 %v2132_v61 }
  0xda   : > { %1951 = vmatpush3.bf16.msra.mxu1 %v2133_v62  ;;  %1932 = vmatprep.subr.bf16.mxu0 %v2337_v1  ;;  %v1628_v62 = vld [vmem:[%s2748_s3 + $0x3] ss:$0 sm:$0xff] }
  0xdb   : > { %1952 = vmatprep.subr.bf16.mxu1 %v2337_v1 }
  0xdd   : > { %1933 = vmatpush3.bf16.msra.mxu0 %v2134_v63 }
  0xde   : > { %1953 = vmatpush3.bf16.msra.mxu1 %v2135_v0  ;;  %1934 = vmatprep.subr.bf16.mxu0 %v2337_v1 }
  0xdf   : > { %1954 = vmatprep.subr.bf16.mxu1 %v2337_v1 }
  0xe1   : > { %1935 = vmatpush3.bf16.msra.mxu0 %v2136_v2 }
  0xe2   : > { %1955 = vmatpush3.bf16.msra.mxu1 %v2137_v3  ;;  %1936 = vmatprep.subr.bf16.mxu0 %v2337_v1 }
  0xe3   : > { %1956 = vmatprep.subr.bf16.mxu1 %v2337_v1 }
  0xe5   : > { %1937 = vmatpush3.bf16.msra.mxu0 %v2138_v4 }
  0xe6   : > { %1957 = vmatpush3.bf16.msra.mxu1 %v2139_v5  ;;  %1962 = vmatprep.subr.bf16.mxu0 %v2337_v1 }
  0xe7   : > { %1982 = vmatprep.subr.bf16.mxu1 %v2337_v1 }
  0xe8   : > { %1939 = vmatmul.mubr.bf16.vlgmr.msra.gmra.mrb[12].mxu0 %v2616_v52 }
  0xe9   : > { %1959 = vmatmul.mubr.bf16.vlgmr.msra.gmra.mrb[12].mxu1 %v2616_v52  ;;  %1963 = vmatpush3.bf16.msra.mxu0 %v2140_v6 }
  0xea   : > { %1983 = vmatpush3.bf16.msra.mxu1 %v2141_v7  ;;  %1964 = vmatprep.subr.bf16.mxu0 %v2337_v1 }
  0xeb   : > { %1984 = vmatprep.subr.bf16.mxu1 %v2337_v1  ;;  %1978 = vmatprep.mubr.msk.bf16.mxu0 %vm2338_vm0, %v2337_v1 }
  0xec   : > { %1998 = vmatprep.mubr.msk.bf16.mxu1 %vm2338_vm0, %v2337_v1 }
  0xed   : > { %1965 = vmatpush3.bf16.msra.mxu0 %v2142_v8 }
  0xee   : > { %1985 = vmatpush3.bf16.msra.mxu1 %v2143_v9  ;;  %1966 = vmatprep.subr.bf16.mxu0 %v2337_v1 }
  0xef   : > { %1986 = vmatprep.subr.bf16.mxu1 %v2337_v1 }
  0xf1   : > { %1967 = vmatpush3.bf16.msra.mxu0 %v2144_v10 }
  0xf2   : > { %1987 = vmatpush3.bf16.msra.mxu1 %v2145_v11  ;;  %1968 = vmatprep.subr.bf16.mxu0 %v2337_v1 }
  0xf3   : > { %1988 = vmatprep.subr.bf16.mxu1 %v2337_v1 }
  0xf5   : > { %1969 = vmatpush3.bf16.msra.mxu0 %v2146_v12 }
  0xf6   : > { %1989 = vmatpush3.bf16.msra.mxu1 %v2147_v13  ;;  %1970 = vmatprep.subr.bf16.mxu0 %v2337_v1  ;;  %v1653_v13 = vld [vmem:[%s2748_s3 + $0x5] ss:$0 sm:$0xff] }
  0xf7   : > { %1990 = vmatprep.subr.bf16.mxu1 %v2337_v1 }
  0xf9   : > { %1971 = vmatpush3.bf16.msra.mxu0 %v2148_v14 }
  0xfa   : > { %1991 = vmatpush3.bf16.msra.mxu1 %v2149_v15  ;;  %1972 = vmatprep.subr.bf16.mxu0 %v2337_v1 }
  0xfb   : > { %1992 = vmatprep.subr.bf16.mxu1 %v2337_v1 }
  0xfd   : > { %1973 = vmatpush3.bf16.msra.mxu0 %v2150_v17 }
  0xfe   : > { %1993 = vmatpush3.bf16.msra.mxu1 %v2151_v18  ;;  %1974 = vmatprep.subr.bf16.mxu0 %v2337_v1 }
  0xff   : > { %1994 = vmatprep.subr.bf16.mxu1 %v2337_v1 }
 0x101   : > { %1975 = vmatpush3.bf16.msra.mxu0 %v2152_v19 }
 0x102   : > { %1995 = vmatpush3.bf16.msra.mxu1 %v2153_v20  ;;  %1976 = vmatprep.subr.bf16.mxu0 %v2337_v1 }
 0x103   : > { %1996 = vmatprep.subr.bf16.mxu1 %v2337_v1 }
 0x105   : > { %1977 = vmatpush3.bf16.msra.mxu0 %v2154_v21 }
 0x106   : > { %1997 = vmatpush3.bf16.msra.mxu1 %v2155_v22 }
 0x108   : > { %1979 = vmatmul.mubr.bf16.vlgmr.msra.gmra.mrb[16].mxu0 %v2616_v52 }
 0x109   : > { %1999 = vmatmul.mubr.bf16.vlgmr.msra.gmra.mrb[16].mxu1 %v2616_v52 }
 0x15b   : > { %v356_v24 = vpop.f32.mrb[0].mxu0 }
 0x15c   : > { %v357_v25 = vadd.f32 %v1594_v23, %v356_v24  ;;  %v479_v26 = vpop.f32.mrb[0].mxu1  ;;  %v1820_v27 = vpop.f32.mrb[1].mxu0 }
 0x15d   : > { %v1840_v28 = vpop.f32.mrb[1].mxu1  ;;  %v359_v29 = vpop.f32.mrb[2].mxu0  ;;  %v480_v36 = vadd.f32 %v1606_v34, %v479_v26 }
 0x15e   : > { %v1603_v30 = vmul.f32 -1.442695, %v357_v25  ;;  %v482_v31 = vpop.f32.mrb[2].mxu1  ;;  %v1821_v32 = vpop.f32.mrb[3].mxu0  ;;  %v729_v29 = vstv %s1626_s12  ;;  %s1709_s12 = sshll.u32 %s2386_s19, 7  ;;  %s2339_s19 = smov [#allocation9]  }
 0x15f   : > { %v1841_v1 = vpop.f32.mrb[3].mxu1  ;;  %v1665_v32 = vld [vmem:[%s2748_s3 + $0x6] ss:$0 sm:$0xff]  ;;  %s2257_s13 = sshll.u32 %s2339_s19, 4  ;;  %s2258_s13 = int_to_ptr.vmem [resolvable:$false] %s2257_s13 }
 0x160   : > { %2156 = vpow2.f32 %v1603_v30  ;;  %v852_v30 = vstv %s1647_s26  ;;  %s243_s26 = scalar_lea.vmem [#allocation9], %s1592_s11  ;;  %s2259_s20 = scalar_lea.vmem %s2258_s13, 256 }
 0x161   : > { %s1489_s29 = sshll.u32 %s243_s26, 4  ;;  %s2703_s29 = int_to_ptr.vmem [resolvable:$true] %s1489_s29 }
 0x162   : > { %p2260_p6 = scmp.lt.s32.totalorder %s2703_s29, %s2258_s13 }
 0x16a   : > { %v2157_v33 = vpop.eup %2156 }
 0x16b   : > { %v365_v35 = vadd.f32 1.0, %v2157_v33 }
 0x16d   : > { %2158 = vrcp.f32 %v365_v35 }
 0x16e   : > { %2160 = vtanh.f32 %v480_v36 }
 0x177   : > { %v2159_v38 = vpop.eup %2158 }
 0x178   : > { %v2161_v45 = vpop.eup %2160  ;;  %v369_v52 = vmul.f32 %v2159_v38, %v368_v40 }
 0x179   : > { %v487_v57 = vmul.f32 %v2161_v45, %v486_v46 }
 0x17a   : > { %v370_v59 = vadd.f32 %v369_v52, %v249_v50  ;;  %v1102_v52 = vstv %s1663_s14  ;;  %s2253_s14 = scalar_lea.vmem %s2703_s29, 128 }
 0x17b   : > { %v596_v41 = vpop.f32.mrb[4].mxu0  ;;  %p2254_p10 = scmp.ne.s32.totalorder %s2703_s29, %s2253_s14  ;;  %p2261_p9 = scmp.lt.s32.totalorder %s2259_s20, %s2253_s14 }
 0x17c   : > { %v597_v42 = vadd.f32 %v1617_v37, %v596_v41  ;;  %v714_v43 = vpop.f32.mrb[4].mxu1  ;;  %v1860_v44 = vpop.f32.mrb[5].mxu0  ;;  %v1676_v41 = vld [vmem:[%s2748_s3 + $0x7] ss:$0 sm:$0xff] }
 0x17d   : > { %v1880_v48 = vpop.f32.mrb[5].mxu1  ;;  %v599_v49 = vpop.f32.mrb[6].mxu0  ;;  %v715_v63 = vadd.f32 %v1628_v62, %v714_v43  ;;  %p2255_p5 = pnand %p2254_p10, %p2767_p1  ;;  %p2262_p11 = por %p2261_p9, %p2260_p6 }
 0x17e   : > { %v602_v53 = vmax.f32 %v597_v42, 0.0  ;;  %v717_v54 = vpop.f32.mrb[6].mxu1  ;;  %v1861_v55 = vpop.f32.mrb[7].mxu0  ;;  %v862_v48 = vstv %s1650_s30  ;;  %v984_v49 = vstv %s1651_s6  ;;  %s2701_s6 = scalar_lea.hbm %s2749_s4, %s1709_s12 }
 0x17f   : > { %v1881_v56 = vpop.f32.mrb[7].mxu1  ;;  %v720_v0 = vmul.f32 %v715_v63, %v715_v63  ;;  %v863_v54 = vmul.f32 %v2611_v51, %v862_v48  ;;  %p2256_p4 = pneg %p2255_p5 }
 0x180   : > { %v604_v58 = vmul.f32 %v603_v47, %v602_v53  ;;  %v1219_v53 = vstv %s1674_s7  ;;  %s1476_s7 = scalar_lea.sflag [#allocation4], %s2526_s10 }
 0x181   : > { %v721_v2 = vmul.f32 %v720_v0, %v715_v63  ;;  %p2263_p0 = pnand %p2262_p11, %p2256_p4 }
 0x182   : > { %v605_v60 = vadd.f32 %v604_v58, %v487_v57 }
 0x183   : > { %v722_v3 = vmul.f32 0.044715, %v721_v2 }
 0x184   : > { %v855_v61 = vadd.f32 %v605_v60, %v370_v59 }
 0x185   : > { %v723_v4 = vadd.f32 %v722_v3, %v715_v63 }
 0x187   : > { %v724_v9 = vmul.f32 0.7978846, %v723_v4 }
 0x19b   : > { %v838_v5 = vpop.f32.mrb[8].mxu0 }
 0x19c   : > { %v839_v6 = vadd.f32 %v1638_v16, %v838_v5  ;;  %v972_v7 = vpop.f32.mrb[8].mxu1  ;;  %v1900_v8 = vpop.f32.mrb[9].mxu0 }
 0x19d   : > { %v1920_v10 = vpop.f32.mrb[9].mxu1  ;;  %v841_v11 = vpop.f32.mrb[10].mxu0  ;;  %v973_v18 = vadd.f32 %v1653_v13, %v972_v7 }
 0x19e   : > { %v1648_v12 = vmul.f32 -1.442695, %v839_v6  ;;  %v975_v14 = vpop.f32.mrb[10].mxu1  ;;  %v1901_v15 = vpop.f32.mrb[11].mxu0 }
 0x19f   : > { %v1921_v17 = vpop.f32.mrb[11].mxu1  ;;  %v1662_v19 = vmul.f32 -1.442695, %v973_v18 }
 0x1a0   : > { %2162 = vpow2.f32 %v1648_v12 }
 0x1a1   : > { %2164 = vtanh.f32 %v724_v9 }
 0x1a2   : > { %2166 = vpow2.f32 %v1662_v19 }
 0x1aa   : > { %v2163_v20 = vpop.eup %2162 }
 0x1ab   : > { %v2165_v21 = vpop.eup %2164  ;;  %v848_v22 = vadd.f32 1.0, %v2163_v20 }
 0x1ac   : > { %v726_v23 = vadd.f32 1.0, %v2165_v21  ;;  %v2167_v25 = vpop.eup %2166  ;;  %v1345_v21 = vstv %s1685_s5 }
 0x1ad   : > { %2168 = vrcp.f32 %v848_v22  ;;  %v981_v27 = vadd.f32 1.0, %v2167_v25 }
 0x1ae   : > { %v727_v24 = vmul.f32 0.5, %v726_v23 }
 0x1af   : > { %2170 = vrcp.f32 %v981_v27 }
 0x1b0   : > { %v728_v26 = vmul.f32 %v727_v24, %v715_v63  ;;  %v1697_v63 = vld [vmem:[%s2748_s3 + $0x9] ss:$0 sm:$0xff]  ;;  %v1468_v24 = vstv %s1706_s9 }
 0x1b2   : > { %v730_v1 = vmul.f32 %v729_v29, %v728_v26 }
 0x1b7   : > { %v2169_v28 = vpop.eup %2168 }
 0x1b8   : > { %v851_v31 = vmul.f32 %v2169_v28, %v839_v6 }
 0x1b9   : > { %v2171_v47 = vpop.eup %2170 }
 0x1ba   : > { %v853_v33 = vmul.f32 %v852_v30, %v851_v31  ;;  %v985_v55 = vmul.f32 %v2171_v47, %v984_v49 }
 0x1bb   : > { %v1095_v34 = vpop.f32.mrb[12].mxu0 }
 0x1bc   : > { %v854_v35 = vadd.f32 %v853_v33, %v730_v1  ;;  %v1096_v36 = vadd.f32 %v1665_v32, %v1095_v34  ;;  %v1212_v37 = vpop.f32.mrb[12].mxu1  ;;  %v1940_v38 = vpop.f32.mrb[13].mxu0  ;;  %v986_v59 = vadd.f32 %v985_v55, %v863_v54 }
 0x1bd   : > { %v1960_v39 = vpop.f32.mrb[13].mxu1  ;;  %v1098_v40 = vpop.f32.mrb[14].mxu0  ;;  %v1213_v46 = vadd.f32 %v1676_v41, %v1212_v37 }
 0x1be   : > { %2172 = vtanh.f32 %v1096_v36  ;;  %v1215_v42 = vpop.f32.mrb[14].mxu1  ;;  %v1941_v43 = vpop.f32.mrb[15].mxu0  ;;  %v856_v44 = vadd.f32 %v855_v61, %v854_v35  ;;  %v1687_v61 = vld [vmem:[%s2748_s3 + $0x8] ss:$0 sm:$0xff] }
 0x1bf   : > { %v1961_v45 = vpop.f32.mrb[15].mxu1  ;;  %v1218_v50 = vmax.f32 %v1213_v46, 0.0 }
 0x1c1   : > { %v1220_v58 = vmul.f32 %v1219_v53, %v1218_v50 }
 0x1c8   : > { %v2173_v56 = vpop.eup %2172 }
 0x1c9   : > { %v1103_v57 = vmul.f32 %v2173_v56, %v1102_v52 }
 0x1cb   : > { %v1221_v60 = vadd.f32 %v1220_v58, %v1103_v57 }
 0x1cd   : > { %v1471_v62 = vadd.f32 %v1221_v60, %v986_v59 }
 0x1db   : > { %v1330_v0 = vpop.f32.mrb[16].mxu0 }
 0x1dc   : > { %v1331_v2 = vadd.f32 %v1687_v61, %v1330_v0  ;;  %v1454_v3 = vpop.f32.mrb[16].mxu1  ;;  %v1980_v4 = vpop.f32.mrb[17].mxu0 }
 0x1dd   : > { %v1455_v51 = vadd.f32 %v1697_v63, %v1454_v3  ;;  %v2000_v16 = vpop.f32.mrb[17].mxu1  ;;  %v1333_v5 = vpop.f32.mrb[18].mxu0 }
 0x1de   : > { %v1336_v6 = vmul.f32 %v1331_v2, %v1331_v2  ;;  %v1457_v7 = vpop.f32.mrb[18].mxu1  ;;  %v1981_v8 = vpop.f32.mrb[19].mxu0 }
 0x1df   : > { %v1707_v9 = vmul.f32 -1.442695, %v1455_v51  ;;  %v2001_v10 = vpop.f32.mrb[19].mxu1 }
 0x1e0   : > { %v1337_v11 = vmul.f32 %v1336_v6, %v1331_v2 }
 0x1e1   : > { %2174 = vpow2.f32 %v1707_v9 }
 0x1e2   : > { %v1338_v12 = vmul.f32 0.044715, %v1337_v11 }
 0x1e4   : > { %v1339_v13 = vadd.f32 %v1338_v12, %v1331_v2 }
 0x1e6   : > { %v1340_v14 = vmul.f32 0.7978846, %v1339_v13 }
 0x1e8   : > { %2176 = vtanh.f32 %v1340_v14 }
 0x1eb   : > { %v2175_v15 = vpop.eup %2174 }
 0x1ec   : > { %v1464_v17 = vadd.f32 1.0, %v2175_v15 }
 0x1ee   : > { %2178 = vrcp.f32 %v1464_v17 }
 0x1f2   : > { %v2177_v18 = vpop.eup %2176 }
 0x1f3   : > { %v1342_v19 = vadd.f32 1.0, %v2177_v18 }
 0x1f5   : > { %v1343_v20 = vmul.f32 0.5, %v1342_v19 }
 0x1f7   : > { %v1344_v22 = vmul.f32 %v1343_v20, %v1331_v2 }
 0x1f8   : > { %v2179_v23 = vpop.eup %2178 }
 0x1f9   : > { %v1346_v25 = vmul.f32 %v1345_v21, %v1344_v22  ;;  %v1467_v26 = vmul.f32 %v2179_v23, %v1455_v51 }
 0x1fb   : > { %v1469_v27 = vmul.f32 %v1468_v24, %v1467_v26 }
 0x1fd   : > { %v1470_v28 = vadd.f32 %v1469_v27, %v1346_v25 }
 0x1ff   : > { %v1472_v29 = vadd.f32 %v1471_v62, %v1470_v28 }
 0x201   : > { %v1473_v30 = vadd.f32 %v1472_v29, %v856_v44 }
 0x203   : > { %1474 = vst [vmem:[%s243_s26] sm:$0xff] %v1473_v30 }
 0x204   : > { %2266 = shalt.err (!%p2263_p0)
}
 0x205   : > { %s2267_s10 = scalar_lea.hbm %s2701_s6, 128  ;;  %s2271_s0 = scalar_lea.hbm %s2749_s4, 256 }
 0x206   : > { %p2268_p2 = scmp.ne.s32.totalorder %s2701_s6, %s2267_s10  ;;  %p2272_p3 = scmp.lt.u32.totalorder %s2701_s6, %s2749_s4 }
 0x207   : > { %p2273_p13 = scmp.lt.u32.totalorder %s2271_s0, %s2267_s10  ;;  %p2275_p10 = scmp.lt.u32.totalorder %s2267_s10, %s2701_s6 }
 0x208   : > { %p2269_p7 = pnand %p2268_p2, %p2767_p1 }
 0x209   : > { %p2274_p8 = por %p2273_p13, %p2272_p3 }
 0x20a   : > { %p2270_p12 = pneg %p2269_p7 }
 0x20b   : > { %p2276_p5 = por %p2275_p10, %p2274_p8 }
 0x20d   : > { %p2277_p4 = pnand %p2276_p5, %p2270_p12 }
 0x20f   : > { %2280 = shalt.err (!%p2277_p4)
}
 0x210   : > { %2012 = dma.vmem_to_hbm [thread:$0]  (%p2767_p1), %s2703_s29, 128, %s2701_s6, %s1476_s7  }
 0x211 PF: > { %s1501_s9 = sand.u32 1, %s2315_s15   ;;  %p2768_p6 = scmp.ne.s32.totalorder %s2757_s28, 0 }
 0x212   : > { %p2769_p9 = scmp.ge.s32.totalorder %s2327_s18, 2  ;;  %s1502_s11 = scalar_lea.sflag [#allocation4], %s1501_s9 }
 0x214   : > { %p2026_p11 = pnand %p2769_p9, %p2768_p6 }
 0x216   : > { %2310 = dma.done.wait (!%p2026_p11), %s1502_s11, 128  }
 0x217   : > { %2312 = vsyncadd (!%p2026_p11), %s1502_s11, 4294967168  ;;  %p19_p0 = scmp.ge.s32.totalorder %s2390_s21, 4   ;;  %s2770_s15 = smov %s2319_s16 }
 0x218   : > { %s2771_s16 = smov %s2323_s17  ;;  %s2772_s17 = smov %s2402_s24 }
 0x219   : > { %s2773_s18 = smov %s2390_s21  ;;  %21 = sbr.rel (!%p19_p0) target bundleno = 9 (0x9), region = 109 }
 0x220   :  { %1507 = vsyncpa [#allocation3], 1 }
 0x221   :  { %1509 = vsyncpa [#allocation3 + $0x1], 1 }
 0x222   :  { %1510 = vsyncpa [#allocation8], 1 }
 0x223   :  { %1511 = vsyncpa [#allocation4], 1 }
 0x224   :  { %1513 = vsyncpa [#allocation4 + $0x1], 1 }
 0x225   :  { %1514 = vsyncpa [#allocation5], 1 }
 0x226   :  { %1516 = vsyncpa [#allocation5 + $0x1], 1 }

</bundles_post_ra>
